<compile_context>
chip_gen: v6e
topology: v6e:2x2x1
jax: 0.10.0
libtpu: 0.0.40
codegen_flags: <defaults>
</compile_context>

<pallas_src>
import math

import jax
import jax.numpy as jnp
from jax import lax
from jax.experimental import pallas as pl
from jax.experimental.pallas import tpu as pltpu


_SQRT_HALF = 1.0 / math.sqrt(2.0)


def _gelu_exact(x):
    # erf formulation == torch.nn.GELU() default
    return 0.5 * x * (1.0 + lax.erf(x * _SQRT_HALF))


def _make_fused_kernel(n_scales):
    """Kernel over one M-tile: runs the full down-sampling chain in VMEM.

    refs = x_0..x_{n-1}            each [tm, T_i]
           (w1,b1,w2,b2) per layer w1:[T_out,T_in] b1:[T_out,1]
                                   w2:[T_out,T_out] b2:[T_out,1]
           o_1..o_{n-1}            each [T_i, tm]   (transposed, M on lanes)
    """
    n_layers = n_scales - 1

    def kernel(*refs):
        x_refs = refs[:n_scales]
        p_refs = refs[n_scales:n_scales + 4 * n_layers]
        o_refs = refs[n_scales + 4 * n_layers:]

        # Transposed compute domain: one XLU transpose per input tile, then
        # every matmul has a dense (>=128 wide) lane dim.
        cur = x_refs[0][...].astype(jnp.float32).T                 # [T0, tm]

        for i in range(n_layers):
            w1, b1, w2, b2 = p_refs[4 * i:4 * i + 4]
            # Linear1: [T_out, T_in] @ [T_in, tm] -> [T_out, tm]   (MXU N = tm)
            h = jnp.dot(w1[...].astype(jnp.float32), cur,
                        preferred_element_type=jnp.float32)
            h = _gelu_exact(h + b1[...].astype(jnp.float32))
            # Linear2: [T_out, T_out] @ [T_out, tm] -> [T_out, tm]
            y = jnp.dot(w2[...].astype(jnp.float32), h,
                        preferred_element_type=jnp.float32)
            y = y + b2[...].astype(jnp.float32)
            low = x_refs[i + 1][...].astype(jnp.float32).T         # [T_{i+1}, tm]
            cur = low + y
            o_refs[i][...] = cur.astype(o_refs[i].dtype)

    return kernel


def _choose_row_tile(M):
    """Tile size over M = B*C.

    If tm < M it must be a multiple of 128 so the [T_i, tm] output blocks stay
    lane-aligned and lane-dense; if tm == M the full-dim exemption applies.
    Bigger tiles amortize the ~0.35 us/step pipeline overhead; 512 keeps the
    double-buffered working set comfortably inside v7x's 64 MiB VMEM for
    typical TimeMixer sequence lengths.
    """
    if M <= 512:
        return M
    return 512


def init_params(key, seq_len, down_sampling_window, down_sampling_layers,
                dtype=jnp.float32):
    """nn.Linear-style init (uniform +/- 1/sqrt(fan_in)).

    Weights are kept in PyTorch layout [out_features, in_features], biases as
    [out_features, 1] — exactly what the transposed-domain kernel consumes.
    """
    params = []
    for i in range(down_sampling_layers):
        t_in = seq_len // down_sampling_window ** i
        t_out = seq_len // down_sampling_window ** (i + 1)
        key, k1, k2, k3, k4 = jax.random.split(key, 5)
        lim1 = 1.0 / math.sqrt(t_in)
        lim2 = 1.0 / math.sqrt(t_out)
        w1 = jax.random.uniform(k1, (t_out, t_in), dtype, -lim1, lim1)
        b1 = jax.random.uniform(k2, (t_out, 1), dtype, -lim1, lim1)
        w2 = jax.random.uniform(k3, (t_out, t_out), dtype, -lim2, lim2)
        b2 = jax.random.uniform(k4, (t_out, 1), dtype, -lim2, lim2)
        params.append((w1, b1, w2, b2))
    return params


def multi_scale_season_mixing(season_list, params):
    """Fused Pallas implementation of MultiScaleSeasonMixing.forward.

    season_list[i]: [B, C, T_i] with T_i = seq_len // dsw**i.
    Returns list of [B, T_i, C] arrays (same as the PyTorch module).
    """
    n = len(season_list)
    assert n >= 2 and len(params) == n - 1
    B, C, _ = season_list[0].shape
    M = B * C
    Ts = [int(s.shape[2]) for s in season_list]
    dtype = season_list[0].dtype

    xs = [s.reshape(M, t) for s, t in zip(season_list, Ts)]   # free reshape
    flat_params = [p for layer in params for p in layer]

    tm = _choose_row_tile(M)
    grid = (pl.cdiv(M, tm),)

    in_specs = [pl.BlockSpec((tm, t), lambda m: (m, 0)) for t in Ts]
    in_specs += [pl.BlockSpec(p.shape, lambda m: (0, 0)) for p in flat_params]
    # Kernel only emits scales 1..n-1; scale 0 is a pure permute done in JAX
    # straight from the input (saves one HBM write pass of the largest tensor).
    out_specs = tuple(pl.BlockSpec((t, tm), lambda m: (0, m)) for t in Ts[1:])
    out_shape = tuple(jax.ShapeDtypeStruct((t, M), dtype) for t in Ts[1:])

    # Advisory cost estimate for the XLA scheduler.
    flops = 0
    transcendentals = 0
    for i in range(n - 1):
        t_in, t_out = Ts[i], Ts[i + 1]
        flops += 2 * M * (t_in * t_out + t_out * t_out) + 3 * M * t_out
        transcendentals += M * t_out
    itemsize = jnp.dtype(dtype).itemsize
    bytes_accessed = (sum(int(x.size) * x.dtype.itemsize for x in xs)
                      + sum(int(p.size) * p.dtype.itemsize for p in flat_params)
                      + sum(M * t * itemsize for t in Ts[1:]))
    cost = pl.CostEstimate(flops=int(flops), transcendentals=int(transcendentals),
                           bytes_accessed=int(bytes_accessed))

    # VMEM budget: double-buffered streamed blocks + resident weights + slack.
    # Capped at 64 MiB so the same tiling is valid on v7x (64 MiB VMEM/TC).
    stream_bytes = (sum(tm * t for t in Ts) + sum(tm * t for t in Ts[1:])) * itemsize
    weight_bytes = sum(int(p.size) * p.dtype.itemsize for p in flat_params)
    vmem_limit = int(min(64 * 1024 * 1024,
                         max(32 * 1024 * 1024,
                             2 * stream_bytes + weight_bytes + (4 << 20))))

    fused = pl.pallas_call(
        _make_fused_kernel(n),
        out_shape=out_shape,
        grid=grid,
        in_specs=in_specs,
        out_specs=out_specs,
        compiler_params=pltpu.CompilerParams(
            dimension_semantics=("parallel",),
            vmem_limit_bytes=vmem_limit),
        cost_estimate=cost,
    )
    outs_t = fused(*xs, *flat_params)      # tuple of [T_i, M] for scales 1..n-1
    if not isinstance(outs_t, (list, tuple)):
        outs_t = (outs_t,)

    out0 = jnp.transpose(season_list[0], (0, 2, 1))           # [B, T0, C]
    # TODO(synk): the final [T_i, B, C] -> [B, T_i, C] permute is a cheap
    # leading-dim swap left to XLA; writing [B, T_i, C] directly would need a
    # non-minor in-kernel transpose and tm to be a multiple of C.
    rest = [jnp.transpose(o.reshape(t, B, C), (1, 0, 2))
            for o, t in zip(outs_t, Ts[1:])]
    return [out0] + rest


def multi_scale_season_mixing_ref(season_list, params):
    """Pure-JAX reference (mirrors the PyTorch code line by line)."""
    n = len(season_list)
    out_high = season_list[0]
    out_low = season_list[1]
    outs = [jnp.transpose(out_high, (0, 2, 1))]
    for i in range(n - 1):
        w1, b1, w2, b2 = params[i]                 # PyTorch [out, in] layout
        h = jnp.einsum("bct,ot->bco", out_high, w1) + b1[:, 0]
        h = jax.nn.gelu(h, approximate=False)
        res = jnp.einsum("bct,ot->bco", h, w2) + b2[:, 0]
        out_low = out_low + res
        out_high = out_low
        if i + 2 <= n - 1:
            out_low = season_list[i + 2]
        outs.append(jnp.transpose(out_high, (0, 2, 1)))
    return outs


if __name__ == "__main__":
    # configs: seq_len=16, down_sampling_window=2, down_sampling_layers=2
    B, C = 2, 4
    seq_len, dsw, n_ds_layers = 16, 2, 2

    key = jax.random.PRNGKey(0)
    key, pkey = jax.random.split(key)
    params = init_params(pkey, seq_len, dsw, n_ds_layers)

    # season_list: [B, C, 16], [B, C, 8], [B, C, 4]
    season_list = []
    for i in range(n_ds_layers + 1):
        key, sk = jax.random.split(key)
        t_i = seq_len // dsw ** i
        season_list.append(jax.random.normal(sk, (B, C, t_i), jnp.float32))

    outs = multi_scale_season_mixing(season_list, params)
    outs = [jax.block_until_ready(o) for o in outs]

    refs = multi_scale_season_mixing_ref(season_list, params)
    for o, r in zip(outs, refs):
        assert o.shape == r.shape, (o.shape, r.shape)
        assert jnp.allclose(o, r, atol=1e-5, rtol=1e-5), "mismatch vs reference"

    print("KERNEL_OK")
</pallas_src>

<mosaic_0001>
module attributes {stable_mosaic.version = 11 : i64} {
  func.func @kernel(%arg0: i32, %arg1: memref<8x16xf32, #tpu.memory_space<vmem>>, %arg2: memref<8x8xf32, #tpu.memory_space<vmem>>, %arg3: memref<8x4xf32, #tpu.memory_space<vmem>>, %arg4: memref<8x16xf32, #tpu.memory_space<vmem>>, %arg5: memref<8x1xf32, #tpu.memory_space<vmem>>, %arg6: memref<8x8xf32, #tpu.memory_space<vmem>>, %arg7: memref<8x1xf32, #tpu.memory_space<vmem>>, %arg8: memref<4x8xf32, #tpu.memory_space<vmem>>, %arg9: memref<4x1xf32, #tpu.memory_space<vmem>>, %arg10: memref<4x4xf32, #tpu.memory_space<vmem>>, %arg11: memref<4x1xf32, #tpu.memory_space<vmem>>, %arg12: memref<8x8xf32, #tpu.memory_space<vmem>>, %arg13: memref<4x8xf32, #tpu.memory_space<vmem>>) attributes {dimension_semantics = [#tpu.dimension_semantics<parallel>], iteration_bounds = array<i64: 1>, scalar_prefetch = 0 : i64, scratch_operands = 0 : i64, tpu.core_type = #tpu.core_type<tc>, window_params = [{transform_indices = @transform_0, window_bounds = array<i64: 8, 16>}, {transform_indices = @transform_1, window_bounds = array<i64: 8, 8>}, {transform_indices = @transform_2, window_bounds = array<i64: 8, 4>}, {pipeline_mode = #tpu.pipeline_mode<synchronous>, transform_indices = @transform_3, window_bounds = array<i64: 8, 16>}, {pipeline_mode = #tpu.pipeline_mode<synchronous>, transform_indices = @transform_4, window_bounds = array<i64: 8, 1>}, {pipeline_mode = #tpu.pipeline_mode<synchronous>, transform_indices = @transform_5, window_bounds = array<i64: 8, 8>}, {pipeline_mode = #tpu.pipeline_mode<synchronous>, transform_indices = @transform_6, window_bounds = array<i64: 8, 1>}, {pipeline_mode = #tpu.pipeline_mode<synchronous>, transform_indices = @transform_7, window_bounds = array<i64: 4, 8>}, {pipeline_mode = #tpu.pipeline_mode<synchronous>, transform_indices = @transform_8, window_bounds = array<i64: 4, 1>}, {pipeline_mode = #tpu.pipeline_mode<synchronous>, transform_indices = @transform_9, window_bounds = array<i64: 4, 4>}, {pipeline_mode = #tpu.pipeline_mode<synchronous>, transform_indices = @transform_10, window_bounds = array<i64: 4, 1>}, {transform_indices = @transform_11, window_bounds = array<i64: 8, 8>}, {transform_indices = @transform_12, window_bounds = array<i64: 4, 8>}]} {
    %c0 = arith.constant 0 : index
    %c0_0 = arith.constant 0 : index
    %0 = vector.load %arg1[%c0, %c0_0] : memref<8x16xf32, #tpu.memory_space<vmem>>, vector<8x16xf32>
    %1 = tpu.transpose %0, [1, 0] : vector<8x16xf32> -> vector<16x8xf32>
    %c0_1 = arith.constant 0 : index
    %c0_2 = arith.constant 0 : index
    %2 = vector.load %arg4[%c0_1, %c0_2] : memref<8x16xf32, #tpu.memory_space<vmem>>, vector<8x16xf32>
    %cst = arith.constant dense<0.000000e+00> : vector<8x8xf32>
    %3 = tpu.matmul %2, %1, %cst {dimension_numbers = #tpu.dot_dimension_numbers<[1], [0], [0], [1], [0, 0, 1, 1], [], []>} : vector<8x16xf32>, vector<16x8xf32>, vector<8x8xf32> -> vector<8x8xf32>
    %c0_3 = arith.constant 0 : index
    %c0_4 = arith.constant 0 : index
    %4 = vector.load %arg5[%c0_3, %c0_4] : memref<8x1xf32, #tpu.memory_space<vmem>>, vector<8x1xf32>
    %5 = vector.broadcast %4 : vector<8x1xf32> to vector<8x8xf32>
    %6 = arith.addf %3, %5 : vector<8x8xf32>
    %cst_5 = arith.constant 5.000000e-01 : f32
    %7 = vector.broadcast %cst_5 : f32 to vector<8x8xf32>
    %8 = arith.mulf %7, %6 : vector<8x8xf32>
    %cst_6 = arith.constant 0.707106769 : f32
    %9 = vector.broadcast %cst_6 : f32 to vector<8x8xf32>
    %10 = arith.mulf %6, %9 : vector<8x8xf32>
    %11 = math.erf %10 : vector<8x8xf32>
    %cst_7 = arith.constant 1.000000e+00 : f32
    %12 = vector.broadcast %cst_7 : f32 to vector<8x8xf32>
    %13 = arith.addf %12, %11 : vector<8x8xf32>
    %14 = arith.mulf %8, %13 : vector<8x8xf32>
    %c0_8 = arith.constant 0 : index
    %c0_9 = arith.constant 0 : index
    %15 = vector.load %arg6[%c0_8, %c0_9] : memref<8x8xf32, #tpu.memory_space<vmem>>, vector<8x8xf32>
    %cst_10 = arith.constant dense<0.000000e+00> : vector<8x8xf32>
    %16 = tpu.matmul %15, %14, %cst_10 {dimension_numbers = #tpu.dot_dimension_numbers<[1], [0], [0], [1], [0, 0, 1, 1], [], []>} : vector<8x8xf32>, vector<8x8xf32>, vector<8x8xf32> -> vector<8x8xf32>
    %c0_11 = arith.constant 0 : index
    %c0_12 = arith.constant 0 : index
    %17 = vector.load %arg7[%c0_11, %c0_12] : memref<8x1xf32, #tpu.memory_space<vmem>>, vector<8x1xf32>
    %18 = vector.broadcast %17 : vector<8x1xf32> to vector<8x8xf32>
    %19 = arith.addf %16, %18 : vector<8x8xf32>
    %c0_13 = arith.constant 0 : index
    %c0_14 = arith.constant 0 : index
    %20 = vector.load %arg2[%c0_13, %c0_14] : memref<8x8xf32, #tpu.memory_space<vmem>>, vector<8x8xf32>
    %21 = tpu.transpose %20, [1, 0] : vector<8x8xf32> -> vector<8x8xf32>
    %22 = arith.addf %21, %19 : vector<8x8xf32>
    %c0_15 = arith.constant 0 : index
    %c0_16 = arith.constant 0 : index
    %23 = vector.load %arg12[%c0_15, %c0_16] : memref<8x8xf32, #tpu.memory_space<vmem>>, vector<8x8xf32>
    tpu.vector_store %arg12[%c0_15, %c0_16], %22 {strides = array<i32>} : memref<8x8xf32, #tpu.memory_space<vmem>>, vector<8x8xf32>,
    %c0_17 = arith.constant 0 : index
    %c0_18 = arith.constant 0 : index
    %24 = vector.load %arg8[%c0_17, %c0_18] : memref<4x8xf32, #tpu.memory_space<vmem>>, vector<4x8xf32>
    %cst_19 = arith.constant dense<0.000000e+00> : vector<4x8xf32>
    %25 = tpu.matmul %24, %22, %cst_19 {dimension_numbers = #tpu.dot_dimension_numbers<[1], [0], [0], [1], [0, 0, 1, 1], [], []>} : vector<4x8xf32>, vector<8x8xf32>, vector<4x8xf32> -> vector<4x8xf32>
    %c0_20 = arith.constant 0 : index
    %c0_21 = arith.constant 0 : index
    %26 = vector.load %arg9[%c0_20, %c0_21] : memref<4x1xf32, #tpu.memory_space<vmem>>, vector<4x1xf32>
    %27 = vector.broadcast %26 : vector<4x1xf32> to vector<4x8xf32>
    %28 = arith.addf %25, %27 : vector<4x8xf32>
    %cst_22 = arith.constant 5.000000e-01 : f32
    %29 = vector.broadcast %cst_22 : f32 to vector<4x8xf32>
    %30 = arith.mulf %29, %28 : vector<4x8xf32>
    %cst_23 = arith.constant 0.707106769 : f32
    %31 = vector.broadcast %cst_23 : f32 to vector<4x8xf32>
    %32 = arith.mulf %28, %31 : vector<4x8xf32>
    %33 = math.erf %32 : vector<4x8xf32>
    %cst_24 = arith.constant 1.000000e+00 : f32
    %34 = vector.broadcast %cst_24 : f32 to vector<4x8xf32>
    %35 = arith.addf %34, %33 : vector<4x8xf32>
    %36 = arith.mulf %30, %35 : vector<4x8xf32>
    %c0_25 = arith.constant 0 : index
    %c0_26 = arith.constant 0 : index
    %37 = vector.load %arg10[%c0_25, %c0_26] : memref<4x4xf32, #tpu.memory_space<vmem>>, vector<4x4xf32>
    %cst_27 = arith.constant dense<0.000000e+00> : vector<4x8xf32>
    %38 = tpu.matmul %37, %36, %cst_27 {dimension_numbers = #tpu.dot_dimension_numbers<[1], [0], [0], [1], [0, 0, 1, 1], [], []>} : vector<4x4xf32>, vector<4x8xf32>, vector<4x8xf32> -> vector<4x8xf32>
    %c0_28 = arith.constant 0 : index
    %c0_29 = arith.constant 0 : index
    %39 = vector.load %arg11[%c0_28, %c0_29] : memref<4x1xf32, #tpu.memory_space<vmem>>, vector<4x1xf32>
    %40 = vector.broadcast %39 : vector<4x1xf32> to vector<4x8xf32>
    %41 = arith.addf %38, %40 : vector<4x8xf32>
    %c0_30 = arith.constant 0 : index
    %c0_31 = arith.constant 0 : index
    %42 = vector.load %arg3[%c0_30, %c0_31] : memref<8x4xf32, #tpu.memory_space<vmem>>, vector<8x4xf32>
    %43 = tpu.transpose %42, [1, 0] : vector<8x4xf32> -> vector<4x8xf32>
    %44 = arith.addf %43, %41 : vector<4x8xf32>
    %c0_32 = arith.constant 0 : index
    %c0_33 = arith.constant 0 : index
    %45 = vector.load %arg13[%c0_32, %c0_33] : memref<4x8xf32, #tpu.memory_space<vmem>>, vector<4x8xf32>
    tpu.vector_store %arg13[%c0_32, %c0_33], %44 {strides = array<i32>} : memref<4x8xf32, #tpu.memory_space<vmem>>, vector<4x8xf32>,
    return
  }
  func.func @transform_0(%arg0: i32) -> (i32, i32) {
    %c0_i32 = arith.constant 0 : i32
    %c0_i32_0 = arith.constant 0 : i32
    return %arg0, %c0_i32 : i32, i32
  }
  func.func @transform_1(%arg0: i32) -> (i32, i32) {
    %c0_i32 = arith.constant 0 : i32
    %c0_i32_0 = arith.constant 0 : i32
    return %arg0, %c0_i32 : i32, i32
  }
  func.func @transform_2(%arg0: i32) -> (i32, i32) {
    %c0_i32 = arith.constant 0 : i32
    %c0_i32_0 = arith.constant 0 : i32
    return %arg0, %c0_i32 : i32, i32
  }
  func.func @transform_3(%arg0: i32) -> (i32, i32) {
    %c0_i32 = arith.constant 0 : i32
    %c0_i32_0 = arith.constant 0 : i32
    %c0_i32_1 = arith.constant 0 : i32
    return %c0_i32, %c0_i32_0 : i32, i32
  }
  func.func @transform_4(%arg0: i32) -> (i32, i32) {
    %c0_i32 = arith.constant 0 : i32
    %c0_i32_0 = arith.constant 0 : i32
    %c0_i32_1 = arith.constant 0 : i32
    return %c0_i32, %c0_i32_0 : i32, i32
  }
  func.func @transform_5(%arg0: i32) -> (i32, i32) {
    %c0_i32 = arith.constant 0 : i32
    %c0_i32_0 = arith.constant 0 : i32
    %c0_i32_1 = arith.constant 0 : i32
    return %c0_i32, %c0_i32_0 : i32, i32
  }
  func.func @transform_6(%arg0: i32) -> (i32, i32) {
    %c0_i32 = arith.constant 0 : i32
    %c0_i32_0 = arith.constant 0 : i32
    %c0_i32_1 = arith.constant 0 : i32
    return %c0_i32, %c0_i32_0 : i32, i32
  }
  func.func @transform_7(%arg0: i32) -> (i32, i32) {
    %c0_i32 = arith.constant 0 : i32
    %c0_i32_0 = arith.constant 0 : i32
    %c0_i32_1 = arith.constant 0 : i32
    return %c0_i32, %c0_i32_0 : i32, i32
  }
  func.func @transform_8(%arg0: i32) -> (i32, i32) {
    %c0_i32 = arith.constant 0 : i32
    %c0_i32_0 = arith.constant 0 : i32
    %c0_i32_1 = arith.constant 0 : i32
    return %c0_i32, %c0_i32_0 : i32, i32
  }
  func.func @transform_9(%arg0: i32) -> (i32, i32) {
    %c0_i32 = arith.constant 0 : i32
    %c0_i32_0 = arith.constant 0 : i32
    %c0_i32_1 = arith.constant 0 : i32
    return %c0_i32, %c0_i32_0 : i32, i32
  }
  func.func @transform_10(%arg0: i32) -> (i32, i32) {
    %c0_i32 = arith.constant 0 : i32
    %c0_i32_0 = arith.constant 0 : i32
    %c0_i32_1 = arith.constant 0 : i32
    return %c0_i32, %c0_i32_0 : i32, i32
  }
  func.func @transform_11(%arg0: i32) -> (i32, i32) {
    %c0_i32 = arith.constant 0 : i32
    %c0_i32_0 = arith.constant 0 : i32
    return %c0_i32, %arg0 : i32, i32
  }
  func.func @transform_12(%arg0: i32) -> (i32, i32) {
    %c0_i32 = arith.constant 0 : i32
    %c0_i32_0 = arith.constant 0 : i32
    return %c0_i32, %arg0 : i32, i32
  }
}

</mosaic_0001>

<bundles_post_ra>
// kernel: tpu_custom_call.1
= control target key start
LH: loop header
LB: loop body
LE: loop exit
PB: predicated region body
PF: predicated region fallthrough
CT: control target
= control target key end

     0   :  { %18 = vsyncpa [#allocation3], 0  ;;  %vm50_vm0 = vcmask 130048   ;;  %v571_v1 = vmov 0.0   ;;  %vm572_vm1 = vmmov 0   ;;  %v573_v4 = vmov 0   ;;  %s689_s0 = inlined_call_operand.vmem [shape: f32[8,16], index: 0, kind: input, shape index: {}]   ;;  %s690_s1 = inlined_call_operand.vmem [shape: f32[8,8], index: 1, kind: input, shape index: {}]   ;;  %s691_s2 = inlined_call_operand.vmem [shape: f32[8,4], index: 2, kind: input, shape index: {}]   ;;  %s692_s3 = inlined_call_operand.vmem [shape: f32[8,16], index: 3, kind: input, shape index: {}]   ;;  %s693_s4 = inlined_call_operand.vmem [shape: f32[8,1], index: 4, kind: input, shape index: {}]   ;;  %s694_s5 = inlined_call_operand.vmem [shape: f32[8,8], index: 5, kind: input, shape index: {}]   ;;  %s695_s6 = inlined_call_operand.vmem [shape: f32[8,1], index: 6, kind: input, shape index: {}]   ;;  %s696_s7 = inlined_call_operand.vmem [shape: f32[4,8], index: 7, kind: input, shape index: {}]   ;;  %s697_s8 = inlined_call_operand.vmem [shape: f32[4,1], index: 8, kind: input, shape index: {}]   ;;  %s698_s9 = inlined_call_operand.vmem [shape: f32[4,4], index: 9, kind: input, shape index: {}]   ;;  %s699_s10 = inlined_call_operand.vmem [shape: f32[4,1], index: 10, kind: input, shape index: {}]   ;;  %s700_s11 = inlined_call_operand.hbm [shape: f32[8,8], index: 11, kind: output, shape index: {0}]   ;;  %s701_s12 = inlined_call_operand.hbm [shape: f32[4,8], index: 12, kind: output, shape index: {1}]  }
   0x1   :  { %v42_v0 = vld [vmem:[%s689_s0] sm:$0xff]  ;;  %496 = vmatprep.subr.mxu0 %v571_v1  ;;  %498 = vmatprep.mubr.msk.f32.mxu0 %vm572_vm1, %v571_v1 }
   0x2   :  { %v44_v2 = vld [vmem:[%s693_s4] sm:$0xff]  ;;  %497 = vmatpush3.xpose.msk.msra.mxu0 %vm50_vm0, %v42_v0  ;;  %521 = vset.pattern.permute.xlu0 %v573_v4 }
   0x3   :  { %v43_v3 = vld [vmem:[%s692_s3] sm:$0xff] }
   0x4   :  { %19 = vsyncpa [#allocation5], 0  ;;  %47 = vperm.xlu0 %521, %v44_v2   ;;  %501 = vmatprep.subr.mxu1 %v571_v1  ;;  %v133_v5 = vld [vmem:[%s695_s6] sm:$0xff]  ;;  %vm139_vm2 = vcmask 64512   ;;  %vm344_vm3 = vcmask 1043456   ;;  %vm340_vm4 = vcmask 31744  }
   0x5   :  { %503 = vmatprep.mubr.msk.f32.mxu1 %vm572_vm1, %v571_v1  ;;  %511 = vmatprep.subr.mxu0 %v571_v1  ;;  %v334_v6 = vld [vmem:[%s699_s10] sm:$0xf] }
   0x6   :  { %499 = vmatmul.mubr.msk.f32.vlgmr.msra.gmra.mxu0 %vm50_vm0, %v43_v3  ;;  %v213_v7 = vld [vmem:[%s690_s1] sm:$0xff] }
   0x7   :  { %513 = vmatprep.mubr.msk.f32.mxu0 %vm572_vm1, %v571_v1  ;;  %214 = vxpose.xlu1.b32.start.end [1/1] (short) (narrow) %v213_v7, 8  ;;  %v132_v17 = vld [vmem:[%s694_s5] sm:$0xff] }
   0x8   :  { %136 = vperm.xlu0 %521, %v133_v5   ;;  %v249_v18 = vld [vmem:[%s697_s8] sm:$0xf] }
   0x9   :  { %v248_v25 = vld [vmem:[%s696_s7] sm:$0xf] }
   0xa   :  { %v418_v26 = vld [vmem:[%s691_s2] sm:$0xff]  ;;  %s574_s2 = smov [#allocation2]  }
   0xb   :  { %v333_v36 = vld [vmem:[%s698_s9] sm:$0xf]  ;;  %s460_s16 = sshll.u32 %s574_s2, 4  ;;  %s461_s16 = int_to_ptr.vmem [resolvable:$true] %s460_s16 }
   0xc   :  { %337 = vperm.xlu0 %521, %v334_v6   ;;  %s527_s17 = scalar_lea.vmem %s461_s16, 128  ;;  %p532_p1 = scmp.lt.s32.totalorder %s461_s16, %s461_s16 }
   0xd   :  { %p528_p0 = scmp.ne.s32.totalorder %s461_s16, %s527_s17  ;;  %p533_p2 = scmp.lt.s32.totalorder %s527_s17, %s527_s17 }
   0xf   :  { %p534_p3 = por %p533_p2, %p532_p1 }
  0x11   :  { %p535_p4 = pnand %p534_p3, %p528_p0 }
  0x25   :  { %522 = vset.pattern.permute.xlu1 %v573_v4 }
  0x26   :  { %252 = vperm.xlu1 %522, %v249_v18  }
  0x2a   :  { %419 = vxpose.xlu0.b32.start.end [1/1] (short) (narrow) %v418_v26, 8 }
  0x7f   :  { %v48_v8 = vpop.permute.xlu0 %47 }
  0x83   :  { %v137_v19 = vpop.permute.xlu0 %136  ;;  %v230_v21 = vpop.trf.xlu1 }
  0xa1   :  { %v253_v27 = vpop.permute.xlu1 %252 }
  0xc6   :  { %v123_v9 = vpop.f32.mrf.mxu0 }
  0xc7   :  { %v124_v10 = vadd.f32 %v123_v9, %v48_v8 }
  0xc8   :  { %v500_v11 = vpop.f32.mrf.mxu0 }
  0xc9   :  { %v128_v12 = vmul.f32 0.70710677, %v124_v10  ;;  %v127_v14 = vmul.f32 0.5, %v124_v10 }
  0xcb   :  { %523 = verf.f32 %v128_v12 }
  0xd8   :  { %v524_v13 = vpop.eup %523 }
  0xd9   :  { %v130_v15 = vadd.f32 1.0, %v524_v13 }
  0xdb   :  { %v131_v16 = vmul.f32 %v130_v15, %v127_v14 }
  0xdd   :  { %502 = vmatpush3.msra.mxu1 %v131_v16 }
  0xde   :  { %504 = vmatmul.mubr.msk.f32.vlgmr.msra.gmra.mxu1 %vm139_vm2, %v132_v17  ;;  %506 = vmatprep.subr.mxu1 %v571_v1 }
  0xdf   :  { %508 = vmatprep.mubr.msk.f32.mxu1 %vm572_vm1, %v571_v1 }
 0x19e   :  { %v209_v20 = vpop.f32.mrf.mxu1 }
 0x19f   :  { %v210_v22 = vadd.f32 %v209_v20, %v137_v19 }
 0x1a0   :  { %v505_v23 = vpop.f32.mrf.mxu1 }
 0x1a1   :  { %v246_v24 = vadd.f32 %v230_v21, %v210_v22 }
 0x1a3   :  { %247 = vst.msk [vmem:[#allocation2] sm:$0xff] %vm139_vm2, %v246_v24  ;;  %507 = vmatpush3.msra.mxu1 %v246_v24 }
 0x1a4   :  { %509 = vmatmul.mubr.msk.f32.vlgmr.msra.gmra.mxu1 %vm139_vm2, %v248_v25 }
 0x264   :  { %v324_v28 = vpop.f32.mrf.mxu1 }
 0x265   :  { %v325_v29 = vadd.f32 %v324_v28, %v253_v27 }
 0x266   :  { %v510_v30 = vpop.f32.mrf.mxu1 }
 0x267   :  { %v329_v31 = vmul.f32 0.70710677, %v325_v29  ;;  %v328_v33 = vmul.f32 0.5, %v325_v29 }
 0x269   :  { %525 = verf.f32 %v329_v31 }
 0x276   :  { %v526_v32 = vpop.eup %525 }
 0x277   :  { %v331_v34 = vadd.f32 1.0, %v526_v32 }
 0x279   :  { %v332_v35 = vmul.f32 %v331_v34, %v328_v33 }
 0x27b   :  { %512 = vmatpush3.msk.msra.mxu0 %vm344_vm3, %v332_v35 }
 0x27c   :  { %514 = vmatmul.mubr.msk.f32.vlgmr.msra.gmra.mxu0 %vm340_vm4, %v333_v36 }
 0x27d   :  { %538 = shalt.err (!%p535_p4)
}
 0x27e   :  { %463 = dma.vmem_to_hbm [thread:$0]  %s461_s16, 128, %s700_s11, [#allocation3]   ;;  %v338_v37 = vpop.permute.xlu0 %337  ;;  %vm452_vm5 = vcmask 60416  }
 0x27f   :  { %s575_s9 = smov [#allocation4]  }
 0x280   :  { %s470_s20 = sshll.u32 %s575_s9, 4  ;;  %s471_s20 = int_to_ptr.vmem [resolvable:$true] %s470_s20 }
 0x281   :  { %s547_s21 = scalar_lea.vmem %s471_s20, 64  ;;  %p552_p6 = scmp.lt.s32.totalorder %s471_s20, %s471_s20 }
 0x282   :  { %v435_v39 = vpop.trf.xlu0  ;;  %p548_p5 = scmp.ne.s32.totalorder %s471_s20, %s547_s21  ;;  %p553_p7 = scmp.lt.s32.totalorder %s547_s21, %s547_s21 }
 0x284   :  { %p554_p8 = por %p553_p7, %p552_p6 }
 0x286   :  { %p555_p9 = pnand %p554_p8, %p548_p5 }
 0x33c   :  { %v414_v38 = vpop.f32.mrf.mxu0 }
 0x33d   :  { %v415_v40 = vadd.f32 %v414_v38, %v338_v37 }
 0x33e   :  { %v515_v41 = vpop.f32.mrf.mxu0 }
 0x33f   :  { %v451_v42 = vadd.f32 %v435_v39, %v415_v40 }
 0x341   :  { %453 = vst.msk [vmem:[#allocation4] sm:$0xf] %vm452_vm5, %v451_v42 }
 0x342   :  { %558 = shalt.err (!%p555_p9)
}
 0x343   :  { %473 = dma.vmem_to_hbm [thread:$0]  %s471_s20, 64, %s701_s12, [#allocation5]  }
 0x344   :  { %567 = dma.done.wait [#allocation3], 128  }
 0x345   :  { %568 = vsyncadd [#allocation3], 4294967168 }
 0x346   :  { %569 = dma.done.wait [#allocation5], 64  }
 0x347   :  { %570 = vsyncadd [#allocation5], 4294967232 }
 0x348   :  { %480 = vsyncpa [#allocation3], 1 }
 0x349   :  { %481 = vsyncpa [#allocation5], 1 }

</bundles_post_ra>
